<compile_context>
chip_gen: v5e
topology: v5e:2x2
jax: 0.10.0
libtpu: 0.0.40
codegen_flags: <defaults>
</compile_context>

<pallas_src>
import functools

import jax
import jax.numpy as jnp
from jax.experimental import pallas as pl
from jax.experimental.pallas import tpu as pltpu


def _triplet_kernel(xall_ref, sqrow_ref, colsum_ref, tcol_ref, trow_ref, out_ref,
                    *, margin, n_total, block_rows):
    xa_raw = xall_ref[...]                       # (n, d)  all rows, native dtype
    if block_rows == n_total:                    # single block: whole buffer
        xb_raw = xa_raw
    else:                                        # slice this block's rows in place
        row0 = pl.multiple_of(pl.program_id(0) * block_rows, block_rows)
        xb_raw = xall_ref[pl.ds(row0, block_rows), :]          # (bm, d) native
    xb = xb_raw.astype(jnp.float32)              # only the (bm, d) block is upcast
    sq_a_row = sqrow_ref[...]                    # (1, n)  ||x_j||^2 (precomputed)
    col_sum = colsum_ref[...]                    # (1, d)  sum_j x_j  (precomputed)
    t_col = tcol_ref[...]                        # (bm, 1) int32
    t_row = trow_ref[...]                        # (1, n)  int32
    n_f = jnp.float32(n_total)

    # ---- pairwise squared distances: block rows vs all rows (one MXU matmul) --
    gram = jax.lax.dot_general(                  # gram[i, j] = <xb_i, xa_j>
        xb_raw, xa_raw, (((1,), (1,)), ((), ())),
        preferred_element_type=jnp.float32)                      # (bm, n)
    sq_b = jnp.sum(xb * xb, axis=1, keepdims=True)               # (bm, 1)
    dist2 = sq_b + sq_a_row - 2.0 * gram                         # (bm, n)

    # ---- hard positive / negative mining (squared domain; sqrt only mined) ----
    mask = t_col == t_row                                        # (bm, n)
    big = jnp.float32(3.0e38)
    d2_ap = jnp.max(jnp.where(mask, dist2, -big), axis=1, keepdims=True)
    d2_an = jnp.min(jnp.where(mask, big, dist2), axis=1, keepdims=True)
    # clamp is monotone, so clamp(min(.)) == min(clamp(.)) — matches
    # dist.clamp(min=1e-12).sqrt() followed by per-row max/min.
    dist_ap = jnp.sqrt(jnp.maximum(d2_ap, 1e-12))
    dist_an = jnp.sqrt(jnp.maximum(d2_an, 1e-12))
    tl_sum = jnp.sum(jnp.maximum(dist_ap - dist_an + margin, 0.0))

    # ---- centroid triplet loss + centroid-contrast loss -----------------------
    pos_cnt = jnp.sum(mask.astype(jnp.float32), axis=1, keepdims=True)   # (bm, 1)
    # Guard only matters for a degenerate single-identity batch (PyTorch NaNs).
    neg_cnt = jnp.maximum(n_f - pos_cnt, 1.0)
    # Native-dtype MXU matmul; the "other class" centroid comes from the column
    # sum complement (no (1 - mask) materialization, no second matmul).
    intra_sum = jax.lax.dot_general(
        mask.astype(xa_raw.dtype), xa_raw, (((1,), (0,)), ((), ())),
        preferred_element_type=jnp.float32)                      # (bm, d)
    other_sum = col_sum - intra_sum
    intra_c = intra_sum * pl.reciprocal(pos_cnt, approx=True)    # EUP, not VPU div
    other_c = other_sum * pl.reciprocal(neg_cnt, approx=True)
    dcp = jnp.sqrt(jnp.sum((intra_c - xb) ** 2, axis=1, keepdims=True))  # (bm, 1)
    dcn = jnp.sqrt(jnp.sum((other_c - xb) ** 2, axis=1, keepdims=True))
    dcc = jnp.sqrt(jnp.sum((intra_c - other_c) ** 2, axis=1, keepdims=True))
    ctl_sum = jnp.sum(jnp.maximum(dcp - dcn + margin, 0.0))
    dcc_sum = jnp.sum(dcc)

    # ---- merged per-block partials: lanes [0,1,2] = [tl_sum, ctl_sum, dcc_sum] --
    lane = jax.lax.broadcasted_iota(jnp.int32, (1, 1, 128), 2)
    out_ref[...] = (jnp.where(lane == 0, tl_sum, 0.0)
                    + jnp.where(lane == 1, ctl_sum, 0.0)
                    + jnp.where(lane == 2, dcc_sum, 0.0))


def _vmem_budget_bytes():
    """~70% of this chip's VMEM; conservative (v7x 64 MiB) fallback."""
    cap = 64 * 1024 * 1024
    try:
        cap = int(pltpu.get_tpu_info().vmem_capacity_bytes)
    except Exception:
        pass
    return int(cap * 0.7)


def _plan_block_rows(n, d, itemsize, budget):
    """Pick the row-block size; returns (block_rows, estimated working set)."""
    def working_set(bm):
        resident = 2 * n * d * itemsize          # resident xall (double-buffered)
        row_blk = bm * d * (itemsize + 4)        # native block slice + f32 copy
        nn_tmps = 6 * bm * n * 4                 # live (bm, n) f32 temporaries
        nd_tmps = 5 * bm * d * 4                 # live (bm, d) f32 temporaries
        small = 8 * (n + d) * 4
        return resident + row_blk + nn_tmps + nd_tmps + small

    # Single block whenever it fits: v5e/v6e have one TensorCore, so the grid is
    # just a serial loop (~0.35us/step overhead) with per-step recomputation.
    if working_set(n) <= budget:
        return n, working_set(n)

    # Otherwise tile the rows.  Cap bm at 128 (v7x 64 MiB VMEM, MXU M-fill) and
    # prefer an even block count so both v7x TensorCores get equal work.
    candidates = [bm for bm in range(8, min(n, 128) + 1, 8)
                  if n % bm == 0 and working_set(bm) <= budget]
    best = None
    for bm in candidates:                        # largest even-nb candidate wins
        if (n // bm) % 2 == 0:
            best = bm
    if best is None and candidates:
        best = candidates[-1]
    if best is None:
        best = 8 if n % 8 == 0 else n
    return best, working_set(best)


def triplet_loss_forward(inputs, targets, epoch=0, *, margin=0.3):
    """Returns (triplet_loss, centroid_triplet_loss, cc_loss) scalars."""
    del epoch  # unused, same as the PyTorch module
    n, d = inputs.shape
    x_f32 = inputs.astype(jnp.float32)
    # Column statistics hoisted out of the kernel (computed once, not per block).
    sq_row = jnp.sum(x_f32 * x_f32, axis=1).reshape(1, n)     # (1, n) ||x_j||^2
    col_sum = jnp.sum(x_f32, axis=0, keepdims=True)           # (1, d) sum_j x_j
    t_col = targets.astype(jnp.int32).reshape(n, 1)
    t_row = targets.astype(jnp.int32).reshape(1, n)

    budget = _vmem_budget_bytes()
    bm, _ws = _plan_block_rows(n, d, inputs.dtype.itemsize, budget)
    nb = n // bm

    kernel = functools.partial(_triplet_kernel, margin=float(margin),
                               n_total=n, block_rows=bm)
    partials = pl.pallas_call(
        kernel,
        out_shape=jax.ShapeDtypeStruct((nb, 1, 128), jnp.float32),
        grid=(nb,),
        in_specs=[
            pl.BlockSpec((n, d), lambda i: (0, 0)),    # all rows (stays resident)
            pl.BlockSpec((1, n), lambda i: (0, 0)),    # precomputed ||x_j||^2 row
            pl.BlockSpec((1, d), lambda i: (0, 0)),    # precomputed column sum
            pl.BlockSpec((bm, 1), lambda i: (i, 0)),   # block labels (column view)
            pl.BlockSpec((1, n), lambda i: (0, 0)),    # all labels (row view)
        ],
        out_specs=pl.BlockSpec((1, 1, 128), lambda i: (i, 0, 0)),
        compiler_params=pltpu.CompilerParams(
            dimension_semantics=("parallel",),         # v7x: row blocks on 2 TCs
            vmem_limit_bytes=int(budget)),
    )(inputs, sq_row, col_sum, t_col, t_row)

    p = jnp.sum(partials[:, 0, :], axis=0)             # (128,) summed block partials
    tl = p[0] / n
    ctl = p[1] / n
    cc = -p[2] / n
    return tl, ctl, cc


def _reference(x, t, margin=0.3):
    # Pure-JAX reference mirroring the PyTorch forward (topk=bottomk=1).
    x = x.astype(jnp.float32)
    n = x.shape[0]
    sq = jnp.sum(x * x, axis=1, keepdims=True)
    dist = jnp.sqrt(jnp.maximum(sq + sq.T - 2.0 * (x @ x.T), 1e-12))
    mask = t[:, None] == t[None, :]
    dist_ap = jnp.max(jnp.where(mask, dist, -jnp.inf), axis=1)
    dist_an = jnp.min(jnp.where(mask, jnp.inf, dist), axis=1)
    tl = jnp.mean(jnp.maximum(dist_ap - dist_an + margin, 0.0))
    mf = mask.astype(x.dtype)
    pc = mf.sum(1, keepdims=True)
    nc = n - pc
    ic = (mf @ x) / pc
    oc = ((1.0 - mf) @ x) / nc
    dcp = jnp.linalg.norm(ic - x, axis=1)
    dcn = jnp.linalg.norm(oc - x, axis=1)
    ctl = jnp.mean(jnp.maximum(dcp - dcn + margin, 0.0))
    cc = -jnp.mean(jnp.linalg.norm(ic - oc, axis=1))
    return tl, ctl, cc


if __name__ == "__main__":
    key = jax.random.PRNGKey(0)
    n, d = 8, 32                       # batch of 8 features, feat_dim 32
    x = jax.random.normal(key, (n, d), dtype=jnp.float32)
    # 4 identities x 2 instances each (typical PK sampling batch)
    targets = jnp.array([0, 0, 1, 1, 2, 2, 3, 3], dtype=jnp.int32)

    tl, ctl, cc = triplet_loss_forward(x, targets, epoch=0, margin=0.3)
    jax.block_until_ready((tl, ctl, cc))

    rtl, rctl, rcc = _reference(x, targets, margin=0.3)
    # Tolerance covers the approx (EUP) reciprocal used for centroid means.
    assert jnp.allclose(tl, rtl, atol=5e-3), (tl, rtl)
    assert jnp.allclose(ctl, rctl, atol=5e-3), (ctl, rctl)
    assert jnp.allclose(cc, rcc, atol=5e-3), (cc, rcc)

    print("KERNEL_OK")
</pallas_src>

<mosaic_0001>
module attributes {stable_mosaic.version = 11 : i64} {
  func.func @_triplet_kernel(%arg0: i32, %arg1: memref<8x32xf32, #tpu.memory_space<vmem>>, %arg2: memref<1x8xf32, #tpu.memory_space<vmem>>, %arg3: memref<1x32xf32, #tpu.memory_space<vmem>>, %arg4: memref<8x1xi32, #tpu.memory_space<vmem>>, %arg5: memref<1x8xi32, #tpu.memory_space<vmem>>, %arg6: memref<1x1x128xf32, #tpu.memory_space<vmem>>) attributes {dimension_semantics = [#tpu.dimension_semantics<parallel>], iteration_bounds = array<i64: 1>, scalar_prefetch = 0 : i64, scratch_operands = 0 : i64, tpu.core_type = #tpu.core_type<tc>, window_params = [{pipeline_mode = #tpu.pipeline_mode<synchronous>, transform_indices = @transform_0, window_bounds = array<i64: 8, 32>}, {pipeline_mode = #tpu.pipeline_mode<synchronous>, transform_indices = @transform_1, window_bounds = array<i64: 1, 8>}, {pipeline_mode = #tpu.pipeline_mode<synchronous>, transform_indices = @transform_2, window_bounds = array<i64: 1, 32>}, {transform_indices = @transform_3, window_bounds = array<i64: 8, 1>}, {pipeline_mode = #tpu.pipeline_mode<synchronous>, transform_indices = @transform_4, window_bounds = array<i64: 1, 8>}, {transform_indices = @transform_5, window_bounds = array<i64: 1, 1, 128>}]} {
    %c0 = arith.constant 0 : index
    %c0_0 = arith.constant 0 : index
    %0 = vector.load %arg1[%c0, %c0_0] : memref<8x32xf32, #tpu.memory_space<vmem>>, vector<8x32xf32>
    %c0_1 = arith.constant 0 : index
    %c0_2 = arith.constant 0 : index
    %1 = vector.load %arg2[%c0_1, %c0_2] : memref<1x8xf32, #tpu.memory_space<vmem>>, vector<1x8xf32>
    %c0_3 = arith.constant 0 : index
    %c0_4 = arith.constant 0 : index
    %2 = vector.load %arg3[%c0_3, %c0_4] : memref<1x32xf32, #tpu.memory_space<vmem>>, vector<1x32xf32>
    %c0_5 = arith.constant 0 : index
    %c0_6 = arith.constant 0 : index
    %3 = vector.load %arg4[%c0_5, %c0_6] : memref<8x1xi32, #tpu.memory_space<vmem>>, vector<8x1xi32>
    %c0_7 = arith.constant 0 : index
    %c0_8 = arith.constant 0 : index
    %4 = vector.load %arg5[%c0_7, %c0_8] : memref<1x8xi32, #tpu.memory_space<vmem>>, vector<1x8xi32>
    %cst = arith.constant dense<0.000000e+00> : vector<8x8xf32>
    %5 = tpu.matmul %0, %0, %cst {dimension_numbers = #tpu.dot_dimension_numbers<[1], [1], [0], [0], [0, 0, 1, 0], [], []>} : vector<8x32xf32>, vector<8x32xf32>, vector<8x8xf32> -> vector<8x8xf32>
    %6 = arith.mulf %0, %0 : vector<8x32xf32>
    %cst_9 = arith.constant dense<0.000000e+00> : vector<8xf32>
    %7 = vector.multi_reduction <add>, %6, %cst_9 [1] : vector<8x32xf32> to vector<8xf32>
    %8 = vector.shape_cast %7 : vector<8xf32> to vector<8x1xf32>
    %9 = vector.broadcast %8 : vector<8x1xf32> to vector<8x8xf32>
    %10 = vector.broadcast %1 : vector<1x8xf32> to vector<8x8xf32>
    %11 = arith.addf %9, %10 : vector<8x8xf32>
    %cst_10 = arith.constant 2.000000e+00 : f32
    %12 = vector.broadcast %cst_10 : f32 to vector<8x8xf32>
    %13 = arith.mulf %12, %5 : vector<8x8xf32>
    %14 = arith.subf %11, %13 : vector<8x8xf32>
    %15 = vector.broadcast %3 : vector<8x1xi32> to vector<8x8xi32>
    %16 = vector.broadcast %4 : vector<1x8xi32> to vector<8x8xi32>
    %17 = arith.cmpi eq, %15, %16 : vector<8x8xi32>
    %cst_11 = arith.constant 0.000000e+00 : f32
    %cst_12 = arith.constant 3.000000e+38 : f32
    %18 = arith.subf %cst_11, %cst_12 : f32
    %19 = vector.broadcast %18 : f32 to vector<8x8xf32>
    %20 = arith.select %17, %14, %19 : vector<8x8xi1>, vector<8x8xf32>
    %cst_13 = arith.constant dense<0xFF800000> : vector<8xf32>
    %21 = vector.multi_reduction <maximumf>, %20, %cst_13 [1] : vector<8x8xf32> to vector<8xf32>
    %22 = vector.shape_cast %21 : vector<8xf32> to vector<8x1xf32>
    %cst_14 = arith.constant 3.000000e+38 : f32
    %23 = vector.broadcast %cst_14 : f32 to vector<8x8xf32>
    %24 = arith.select %17, %23, %14 : vector<8x8xi1>, vector<8x8xf32>
    %cst_15 = arith.constant dense<0x7F800000> : vector<8xf32>
    %25 = vector.multi_reduction <minimumf>, %24, %cst_15 [1] : vector<8x8xf32> to vector<8xf32>
    %26 = vector.shape_cast %25 : vector<8xf32> to vector<8x1xf32>
    %cst_16 = arith.constant 9.99999996E-13 : f32
    %27 = vector.broadcast %cst_16 : f32 to vector<8x1xf32>
    %28 = arith.maximumf %22, %27 : vector<8x1xf32>
    %29 = math.sqrt %28 : vector<8x1xf32>
    %cst_17 = arith.constant 9.99999996E-13 : f32
    %30 = vector.broadcast %cst_17 : f32 to vector<8x1xf32>
    %31 = arith.maximumf %26, %30 : vector<8x1xf32>
    %32 = math.sqrt %31 : vector<8x1xf32>
    %33 = arith.subf %29, %32 : vector<8x1xf32>
    %cst_18 = arith.constant 3.000000e-01 : f32
    %34 = vector.broadcast %cst_18 : f32 to vector<8x1xf32>
    %35 = arith.addf %33, %34 : vector<8x1xf32>
    %cst_19 = arith.constant 0.000000e+00 : f32
    %36 = vector.broadcast %cst_19 : f32 to vector<8x1xf32>
    %37 = arith.maximumf %35, %36 : vector<8x1xf32>
    %38 = vector.shape_cast %37 : vector<8x1xf32> to vector<1x8x1xf32>
    %cst_20 = arith.constant dense<0.000000e+00> : vector<1xf32>
    %39 = vector.multi_reduction <add>, %38, %cst_20 [1, 2] : vector<1x8x1xf32> to vector<1xf32>
    %40 = vector.shape_cast %39 : vector<1xf32> to vector<1x1x1xf32>
    %41 = vector.extract %40[0, 0, 0] : f32 from vector<1x1x1xf32>
    %42 = arith.extui %17 : vector<8x8xi1> to vector<8x8xi32>
    %43 = arith.sitofp %42 : vector<8x8xi32> to vector<8x8xf32>
    %cst_21 = arith.constant dense<0.000000e+00> : vector<8xf32>
    %44 = vector.multi_reduction <add>, %43, %cst_21 [1] : vector<8x8xf32> to vector<8xf32>
    %45 = vector.shape_cast %44 : vector<8xf32> to vector<8x1xf32>
    %cst_22 = arith.constant 8.000000e+00 : f32
    %46 = vector.broadcast %cst_22 : f32 to vector<8x1xf32>
    %47 = arith.subf %46, %45 : vector<8x1xf32>
    %cst_23 = arith.constant 1.000000e+00 : f32
    %48 = vector.broadcast %cst_23 : f32 to vector<8x1xf32>
    %49 = arith.maximumf %47, %48 : vector<8x1xf32>
    %50 = arith.extui %17 : vector<8x8xi1> to vector<8x8xi32>
    %51 = arith.sitofp %50 : vector<8x8xi32> to vector<8x8xf32>
    %cst_24 = arith.constant dense<0.000000e+00> : vector<8x32xf32>
    %52 = tpu.matmul %51, %0, %cst_24 {dimension_numbers = #tpu.dot_dimension_numbers<[1], [0], [0], [1], [0, 0, 1, 1], [], []>} : vector<8x8xf32>, vector<8x32xf32>, vector<8x32xf32> -> vector<8x32xf32>
    %53 = vector.broadcast %2 : vector<1x32xf32> to vector<8x32xf32>
    %54 = arith.subf %53, %52 : vector<8x32xf32>
    %55 = tpu.reciprocal %45 {approx = true} : vector<8x1xf32> -> vector<8x1xf32>
    %56 = vector.broadcast %55 : vector<8x1xf32> to vector<8x32xf32>
    %57 = arith.mulf %52, %56 : vector<8x32xf32>
    %58 = tpu.reciprocal %49 {approx = true} : vector<8x1xf32> -> vector<8x1xf32>
    %59 = vector.broadcast %58 : vector<8x1xf32> to vector<8x32xf32>
    %60 = arith.mulf %54, %59 : vector<8x32xf32>
    %61 = arith.subf %57, %0 : vector<8x32xf32>
    %62 = arith.mulf %61, %61 : vector<8x32xf32>
    %cst_25 = arith.constant dense<0.000000e+00> : vector<8xf32>
    %63 = vector.multi_reduction <add>, %62, %cst_25 [1] : vector<8x32xf32> to vector<8xf32>
    %64 = vector.shape_cast %63 : vector<8xf32> to vector<8x1xf32>
    %65 = math.sqrt %64 : vector<8x1xf32>
    %66 = arith.subf %60, %0 : vector<8x32xf32>
    %67 = arith.mulf %66, %66 : vector<8x32xf32>
    %cst_26 = arith.constant dense<0.000000e+00> : vector<8xf32>
    %68 = vector.multi_reduction <add>, %67, %cst_26 [1] : vector<8x32xf32> to vector<8xf32>
    %69 = vector.shape_cast %68 : vector<8xf32> to vector<8x1xf32>
    %70 = math.sqrt %69 : vector<8x1xf32>
    %71 = arith.subf %57, %60 : vector<8x32xf32>
    %72 = arith.mulf %71, %71 : vector<8x32xf32>
    %cst_27 = arith.constant dense<0.000000e+00> : vector<8xf32>
    %73 = vector.multi_reduction <add>, %72, %cst_27 [1] : vector<8x32xf32> to vector<8xf32>
    %74 = vector.shape_cast %73 : vector<8xf32> to vector<8x1xf32>
    %75 = math.sqrt %74 : vector<8x1xf32>
    %76 = arith.subf %65, %70 : vector<8x1xf32>
    %cst_28 = arith.constant 3.000000e-01 : f32
    %77 = vector.broadcast %cst_28 : f32 to vector<8x1xf32>
    %78 = arith.addf %76, %77 : vector<8x1xf32>
    %cst_29 = arith.constant 0.000000e+00 : f32
    %79 = vector.broadcast %cst_29 : f32 to vector<8x1xf32>
    %80 = arith.maximumf %78, %79 : vector<8x1xf32>
    %81 = vector.shape_cast %80 : vector<8x1xf32> to vector<1x8x1xf32>
    %cst_30 = arith.constant dense<0.000000e+00> : vector<1xf32>
    %82 = vector.multi_reduction <add>, %81, %cst_30 [1, 2] : vector<1x8x1xf32> to vector<1xf32>
    %83 = vector.shape_cast %82 : vector<1xf32> to vector<1x1x1xf32>
    %84 = vector.extract %83[0, 0, 0] : f32 from vector<1x1x1xf32>
    %85 = vector.shape_cast %75 : vector<8x1xf32> to vector<1x8x1xf32>
    %cst_31 = arith.constant dense<0.000000e+00> : vector<1xf32>
    %86 = vector.multi_reduction <add>, %85, %cst_31 [1, 2] : vector<1x8x1xf32> to vector<1xf32>
    %87 = vector.shape_cast %86 : vector<1xf32> to vector<1x1x1xf32>
    %88 = vector.extract %87[0, 0, 0] : f32 from vector<1x1x1xf32>
    %89 = tpu.iota {dimensions = array<i32: 2>} : vector<1x1x128xi32>
    %c0_i32 = arith.constant 0 : i32
    %90 = vector.broadcast %c0_i32 : i32 to vector<1x1x128xi32>
    %91 = arith.cmpi eq, %89, %90 : vector<1x1x128xi32>
    %cst_32 = arith.constant 0.000000e+00 : f32
    %92 = vector.broadcast %41 : f32 to vector<1x1x128xf32>
    %93 = vector.broadcast %cst_32 : f32 to vector<1x1x128xf32>
    %94 = arith.select %91, %92, %93 : vector<1x1x128xi1>, vector<1x1x128xf32>
    %c1_i32 = arith.constant 1 : i32
    %95 = vector.broadcast %c1_i32 : i32 to vector<1x1x128xi32>
    %96 = arith.cmpi eq, %89, %95 : vector<1x1x128xi32>
    %cst_33 = arith.constant 0.000000e+00 : f32
    %97 = vector.broadcast %84 : f32 to vector<1x1x128xf32>
    %98 = vector.broadcast %cst_33 : f32 to vector<1x1x128xf32>
    %99 = arith.select %96, %97, %98 : vector<1x1x128xi1>, vector<1x1x128xf32>
    %100 = arith.addf %94, %99 : vector<1x1x128xf32>
    %c2_i32 = arith.constant 2 : i32
    %101 = vector.broadcast %c2_i32 : i32 to vector<1x1x128xi32>
    %102 = arith.cmpi eq, %89, %101 : vector<1x1x128xi32>
    %cst_34 = arith.constant 0.000000e+00 : f32
    %103 = vector.broadcast %88 : f32 to vector<1x1x128xf32>
    %104 = vector.broadcast %cst_34 : f32 to vector<1x1x128xf32>
    %105 = arith.select %102, %103, %104 : vector<1x1x128xi1>, vector<1x1x128xf32>
    %106 = arith.addf %100, %105 : vector<1x1x128xf32>
    %c0_35 = arith.constant 0 : index
    %c0_36 = arith.constant 0 : index
    %c0_37 = arith.constant 0 : index
    %107 = vector.load %arg6[%c0_35, %c0_36, %c0_37] : memref<1x1x128xf32, #tpu.memory_space<vmem>>, vector<1x1x128xf32>
    tpu.vector_store %arg6[%c0_35, %c0_36, %c0_37], %106 {strides = array<i32>} : memref<1x1x128xf32, #tpu.memory_space<vmem>>, vector<1x1x128xf32>,
    return
  }
  func.func @transform_0(%arg0: i32) -> (i32, i32) {
    %c0_i32 = arith.constant 0 : i32
    %c0_i32_0 = arith.constant 0 : i32
    %c0_i32_1 = arith.constant 0 : i32
    return %c0_i32, %c0_i32_0 : i32, i32
  }
  func.func @transform_1(%arg0: i32) -> (i32, i32) {
    %c0_i32 = arith.constant 0 : i32
    %c0_i32_0 = arith.constant 0 : i32
    %c0_i32_1 = arith.constant 0 : i32
    return %c0_i32, %c0_i32_0 : i32, i32
  }
  func.func @transform_2(%arg0: i32) -> (i32, i32) {
    %c0_i32 = arith.constant 0 : i32
    %c0_i32_0 = arith.constant 0 : i32
    %c0_i32_1 = arith.constant 0 : i32
    return %c0_i32, %c0_i32_0 : i32, i32
  }
  func.func @transform_3(%arg0: i32) -> (i32, i32) {
    %c0_i32 = arith.constant 0 : i32
    %c0_i32_0 = arith.constant 0 : i32
    return %arg0, %c0_i32 : i32, i32
  }
  func.func @transform_4(%arg0: i32) -> (i32, i32) {
    %c0_i32 = arith.constant 0 : i32
    %c0_i32_0 = arith.constant 0 : i32
    %c0_i32_1 = arith.constant 0 : i32
    return %c0_i32, %c0_i32_0 : i32, i32
  }
  func.func @transform_5(%arg0: i32) -> (i32, i32, i32) {
    %c0_i32 = arith.constant 0 : i32
    %c0_i32_0 = arith.constant 0 : i32
    %c0_i32_1 = arith.constant 0 : i32
    return %arg0, %c0_i32, %c0_i32_0 : i32, i32, i32
  }
}

</mosaic_0001>

<bundles_post_ra>
// kernel: tpu_custom_call.1
= control target key start
LH: loop header
LB: loop body
LE: loop exit
PB: predicated region body
PF: predicated region fallthrough
CT: control target
= control target key end

     0   :  { %10 = vsyncpa [#allocation3], 0  ;;  %s420_s0 = inlined_call_operand.vmem [shape: f32[8,32], index: 0, kind: input, shape index: {}]   ;;  %s421_s1 = inlined_call_operand.vmem [shape: f32[1,8], index: 1, kind: input, shape index: {}]   ;;  %s422_s2 = inlined_call_operand.hbm [shape: f32[1,32], index: 2, kind: input, shape index: {}]   ;;  %s423_s3 = inlined_call_operand.vmem [shape: s32[8,1], index: 3, kind: input, shape index: {}]   ;;  %s424_s4 = inlined_call_operand.vmem [shape: s32[1,8], index: 4, kind: input, shape index: {}]   ;;  %s425_s5 = inlined_call_operand.hbm [shape: f32[1,1,128], index: 5, kind: output, shape index: {}]  }
   0x1   :  { %11 = vsyncpa [#allocation4], 0  ;;  %s21_s20 = sshll.u32 %s422_s2, 4  ;;  %s355_s21 = smov [#allocation2]   ;;  %s22_s20 = int_to_ptr.hbm [resolvable:$true] %s21_s20 }
   0x2   :  { %s23_s22 = sshll.u32 %s355_s21, 4  ;;  %s24_s22 = int_to_ptr.vmem [resolvable:$true] %s23_s22 }
   0x3   :  { %26 = dma.hbm_to_vmem [thread:$0]  %s22_s20, 16, %s24_s22, [#allocation3]  }
   0x4   :  { %351 = dma.done.wait [#allocation3], 16  }
   0x5   :  { %352 = vsyncadd [#allocation3], 4294967280  ;;  %v356_v0 = vmov 0   ;;  %vm40_vm0 = vcmask 261120   ;;  %v38_v1 = vld [vmem:[%s423_s3] sm:$0xff]  ;;  %vm80_vm1 = vcmask 64512  }
   0x6   :  { %285 = vset.pattern.permute.xlu0 %v356_v0  ;;  %v35_v2 = vld [vmem:[%s420_s0] sm:$0xff]  ;;  %v357_v7 = vmov 0.0   ;;  %vm117_vm7 = vcmask 7168   ;;  %s358_s29 = smov [#allocation5]   ;;  %s261_s8 = sshll.u32 %s425_s5, 4  ;;  %s262_s8 = int_to_ptr.hbm [resolvable:$true] %s261_s8 }
   0x7   :  { %75 = vperm.xlu0 %285, %v38_v1   ;;  %271 = vmatpush.xpose.msk.msra.mxu0 %vm40_vm0, %v35_v2  ;;  %v64_v3 = vmul.f32 %v35_v2, %v35_v2  ;;  %v286_v5 = vld [vmem:[%s424_s4] ss:$0 sm:$0xff]  ;;  %s259_s30 = sshll.u32 %s358_s29, 4  ;;  %s260_s30 = int_to_ptr.vmem [resolvable:$true] %s259_s30 }
   0x8   :  { %153 = vmatpush.msra.mxu1 %v35_v2  ;;  %v287_v10 = vld [vmem:[%s421_s1] ss:$0 sm:$0xff] }
   0x9   :  { %v65_v4 = vsel %vm40_vm0, %v64_v3, 0.0  ;;  %v288_v23 = vld [vmem:[#allocation2] ss:$0 sm:$0xff] }
   0xa   :  { %272 = vmatmul.msk.f32.vlgmr.msra.gmra.mxu0 %vm40_vm0, %v35_v2  ;;  %66 = vadd.xlane.f32.xlu1 %v65_v4 }
  0x79   :  { %v76_v6 = vpop.permute.xlu0 %75 }
  0x7a   :  { %vm78_vm2 = vcmp.eq.s32.totalorder %v76_v6, %v286_v5 }
  0x7b   :  { %v273_v8 = vsel %vm78_vm2, 1.0, %v357_v7 }
  0x7c   :  { %274 = vmatmul.msk.f32.vlgmr.msra.gmra.mxu1 %vm80_vm1, %v273_v8  ;;  %v130_v9 = vsel %vm80_vm1, %v273_v8, 0.0 }
  0x7d   :  { %131 = vadd.xlane.f32.xlu0 %v130_v9  ;;  %v67_v11 = vpop.xlane.xlu1 %66 }
  0x7e   :  { %v71_v12 = vadd.f32 %v287_v10, %v67_v11 }
  0x87   :  { %v61_v13 = vpop.f32.mrf.mxu0 }
  0x88   :  { %v72_v14 = vmul.f32 2.0, %v61_v13 }
  0x8a   :  { %v73_v15 = vsub.f32 %v71_v12, %v72_v14 }
  0x8c   :  { %v84_v16 = vsel %vm78_vm2, 3e+38, %v73_v15  ;;  %v79_v17 = vsel %vm78_vm2, %v73_v15, -3e+38 }
  0x8d   :  { %v85_v18 = vsel %vm80_vm1, %v84_v16, inf  ;;  %v81_v19 = vsel %vm80_vm1, %v79_v17, -inf }
  0x8e   :  { %86 = vmin.xlane.f32.xlu2 %v85_v18  ;;  %82 = vmax.xlane.f32.xlu1 %v81_v19 }
  0xf0   :  { %v132_v20 = vpop.xlane.xlu0 %131 }
  0xf1   :  { %v133_v21 = vsub.f32 8.0, %v132_v20  ;;  %289 = vrcp.f32 %v132_v20 }
  0xf3   :  { %v134_v22 = vmax.f32 %v133_v21, 1.0 }
  0xf5   :  { %291 = vrcp.f32 %v134_v22 }
  0xf7   :  { %v290_v24 = vpop.eup %289 }
  0xf9   :  { %v155_v25 = vpop.f32.mrf.mxu1 }
  0xfa   :  { %v161_v26 = vsub.f32 %v288_v23, %v155_v25  ;;  %v163_v27 = vmul.f32 %v290_v24, %v155_v25 }
  0xfb   :  { %v292_v28 = vpop.eup %291 }
  0xfc   :  { %v165_v29 = vmul.f32 %v292_v28, %v161_v26  ;;  %v166_v30 = vsub.f32 %v163_v27, %v35_v2 }
  0xfe   :  { %v167_v31 = vmul.f32 %v166_v30, %v166_v30  ;;  %v183_v32 = vsub.f32 %v165_v29, %v35_v2  ;;  %v200_v33 = vsub.f32 %v163_v27, %v165_v29 }
 0x100   :  { %v168_v34 = vsel %vm40_vm0, %v167_v31, 0.0  ;;  %v184_v35 = vmul.f32 %v183_v32, %v183_v32  ;;  %v201_v41 = vmul.f32 %v200_v33, %v200_v33 }
 0x101   :  { %169 = vadd.xlane.f32.xlu2 %v168_v34  ;;  %v87_v36 = vpop.xlane.xlu2 %86  ;;  %v83_v37 = vpop.xlane.xlu1 %82 }
 0x102   :  { %v101_v38 = vmax.f32 %v87_v36, 1e-12  ;;  %v88_v39 = vmax.f32 %v83_v37, 1e-12  ;;  %v185_v40 = vsel %vm40_vm0, %v184_v35, 0.0  ;;  %v202_v42 = vsel %vm40_vm0, %v201_v41, 0.0 }
 0x103   :  { %186 = vadd.xlane.f32.xlu1 %v185_v40 }
 0x104   :  { %293 = vrsqrt.f32 %v101_v38  ;;  %vm109_vm3 = vcmp.eq.f32.partialorder %v101_v38, inf  ;;  %v112_v57 = vand.u32 2147483648, %v101_v38  ;;  %vm96_vm4 = vcmp.eq.f32.partialorder %v88_v39, inf }
 0x105   :  { %295 = vrsqrt.f32 %v88_v39  ;;  %v99_v58 = vand.u32 2147483648, %v88_v39  ;;  %vm111_vm5 = vcmp.eq.f32.partialorder %v101_v38, 0.0  ;;  %vm98_vm6 = vcmp.eq.f32.partialorder %v88_v39, 0.0 }
 0x109   :  { %203 = vadd.xlane.f32.xlu2 %v202_v42 }
 0x10a   :  { %v294_v43 = vpop.eup %293 }
 0x10b   :  { %v296_v44 = vpop.eup %295  ;;  %v103_v45 = vmul.f32 %v294_v43, %v101_v38 }
 0x10c   :  { %v90_v46 = vmul.f32 %v296_v44, %v88_v39 }
 0x10d   :  { %v104_v47 = vmul.f32 %v294_v43, %v103_v45 }
 0x10e   :  { %v91_v48 = vmul.f32 %v296_v44, %v90_v46 }
 0x10f   :  { %v105_v49 = vmul.f32 0.5, %v104_v47 }
 0x110   :  { %v92_v50 = vmul.f32 0.5, %v91_v48 }
 0x111   :  { %v106_v51 = vsub.f32 1.5, %v105_v49 }
 0x112   :  { %v93_v52 = vsub.f32 1.5, %v92_v50 }
 0x113   :  { %v107_v53 = vmul.f32 %v294_v43, %v106_v51 }
 0x114   :  { %v94_v54 = vmul.f32 %v296_v44, %v93_v52 }
 0x115   :  { %v108_v55 = vmul.f32 %v107_v53, %v101_v38 }
 0x116   :  { %v95_v56 = vmul.f32 %v94_v54, %v88_v39 }
 0x117   :  { %v110_v59 = vsel %vm109_vm3, %v101_v38, %v108_v55 }
 0x118   :  { %v97_v60 = vsel %vm96_vm4, %v88_v39, %v95_v56  ;;  %v113_v61 = vsel %vm111_vm5, %v112_v57, %v110_v59 }
 0x119   :  { %v100_v62 = vsel %vm98_vm6, %v99_v58, %v97_v60 }
 0x11a   :  { %v114_v63 = vsub.f32 %v100_v62, %v113_v61  ;;  %v240_v62 = vlaneseq }
 0x11c   :  { %v115_v0 = vadd.f32 0.3, %v114_v63  ;;  %v241_v63 = vand.u32 127, %v240_v62 }
 0x11e   :  { %v116_v1 = vmax.f32 %v115_v0, 0.0  ;;  %vm242_vm14 = vcmp.eq.s32.totalorder %v241_v63, 0  ;;  %vm245_vm15 = vcmp.eq.s32.totalorder %v241_v63, 1  ;;  %vm249_vm0 = vcmp.eq.s32.totalorder %v241_v63, 2 }
 0x120   :  { %v118_v2 = vsel %vm117_vm7, %v116_v1, 0.0 }
 0x121   :  { %119 = vadd.xlane.f32.xlu1 %v118_v2 }
 0x174   :  { %v170_v3 = vpop.xlane.xlu2 %169 }
 0x175   :  { %297 = vrsqrt.f32 %v170_v3  ;;  %vm178_vm8 = vcmp.eq.f32.partialorder %v170_v3, inf  ;;  %v181_v25 = vand.u32 2147483648, %v170_v3  ;;  %vm180_vm10 = vcmp.eq.f32.partialorder %v170_v3, 0.0 }
 0x176   :  { %v187_v4 = vpop.xlane.xlu1 %186 }
 0x177   :  { %299 = vrsqrt.f32 %v187_v4  ;;  %vm195_vm9 = vcmp.eq.f32.partialorder %v187_v4, inf  ;;  %v198_v26 = vand.u32 2147483648, %v187_v4  ;;  %vm197_vm11 = vcmp.eq.f32.partialorder %v187_v4, 0.0 }
 0x17b   :  { %v298_v5 = vpop.eup %297 }
 0x17c   :  { %v172_v6 = vmul.f32 %v298_v5, %v170_v3  ;;  %v204_v7 = vpop.xlane.xlu2 %203 }
 0x17d   :  { %v300_v8 = vpop.eup %299  ;;  %301 = vrsqrt.f32 %v204_v7  ;;  %vm212_vm12 = vcmp.eq.f32.partialorder %v204_v7, inf  ;;  %v215_v35 = vand.u32 2147483648, %v204_v7  ;;  %vm214_vm13 = vcmp.eq.f32.partialorder %v204_v7, 0.0 }
 0x17e   :  { %v189_v9 = vmul.f32 %v300_v8, %v187_v4  ;;  %v173_v10 = vmul.f32 %v298_v5, %v172_v6 }
 0x180   :  { %v174_v11 = vmul.f32 0.5, %v173_v10  ;;  %v190_v12 = vmul.f32 %v300_v8, %v189_v9 }
 0x182   :  { %v175_v13 = vsub.f32 1.5, %v174_v11  ;;  %v191_v14 = vmul.f32 0.5, %v190_v12 }
 0x183   :  { %v302_v15 = vpop.eup %301 }
 0x184   :  { %v206_v16 = vmul.f32 %v302_v15, %v204_v7  ;;  %v176_v17 = vmul.f32 %v298_v5, %v175_v13  ;;  %v192_v18 = vsub.f32 1.5, %v191_v14 }
 0x186   :  { %v207_v19 = vmul.f32 %v302_v15, %v206_v16  ;;  %v177_v20 = vmul.f32 %v176_v17, %v170_v3  ;;  %v193_v21 = vmul.f32 %v300_v8, %v192_v18 }
 0x188   :  { %v208_v22 = vmul.f32 0.5, %v207_v19  ;;  %v179_v23 = vsel %vm178_vm8, %v170_v3, %v177_v20  ;;  %v194_v24 = vmul.f32 %v193_v21, %v187_v4 }
 0x189   :  { %v182_v29 = vsel %vm180_vm10, %v181_v25, %v179_v23 }
 0x18a   :  { %v209_v27 = vsub.f32 1.5, %v208_v22  ;;  %v196_v28 = vsel %vm195_vm9, %v187_v4, %v194_v24 }
 0x18b   :  { %v199_v30 = vsel %vm197_vm11, %v198_v26, %v196_v28 }
 0x18c   :  { %v210_v31 = vmul.f32 %v302_v15, %v209_v27  ;;  %v217_v32 = vsub.f32 %v182_v29, %v199_v30 }
 0x18e   :  { %v211_v33 = vmul.f32 %v210_v31, %v204_v7  ;;  %v218_v34 = vadd.f32 0.3, %v217_v32 }
 0x190   :  { %v213_v36 = vsel %vm212_vm12, %v204_v7, %v211_v33  ;;  %v219_v37 = vmax.f32 %v218_v34, 0.0 }
 0x191   :  { %v216_v38 = vsel %vm214_vm13, %v215_v35, %v213_v36 }
 0x192   :  { %v230_v39 = vsel %vm117_vm7, %v216_v38, 0.0  ;;  %v220_v40 = vsel %vm117_vm7, %v219_v37, 0.0 }
 0x193   :  { %231 = vadd.xlane.f32.xlu1 %v230_v39  ;;  %221 = vadd.xlane.f32.xlu2 %v220_v40 }
 0x194   :  { %v120_v41 = vpop.xlane.xlu1 %119 }
 0x195   :  { %v121_v42 = vrot.slane %v120_v41, 4 }
 0x197   :  { %v122_v43 = vadd.f32 %v121_v42, %v120_v41 }
 0x199   :  { %v123_v44 = vrot.slane %v122_v43, 2 }
 0x19b   :  { %v124_v45 = vadd.f32 %v123_v44, %v122_v43 }
 0x19d   :  { %v125_v46 = vrot.slane %v124_v45, 1 }
 0x19f   :  { %v126_v47 = vadd.f32 %v125_v46, %v124_v45 }
 0x1a1   :  { %275 = vpush %v126_v47 }
 0x1d2   :  { %s276_s1 = spop %275 }
 0x1d3   :  { %v243_v0 = vstv %s276_s1 }
 0x1d4   :  { %v244_v2 = vsel %vm242_vm14, %v243_v0, 0.0 }
 0x206   :  { %v222_v48 = vpop.xlane.xlu2 %221  ;;  %v232_v49 = vpop.xlane.xlu1 %231 }
 0x207   :  { %v223_v50 = vrot.slane %v222_v48, 4  ;;  %v233_v51 = vrot.slane %v232_v49, 4 }
 0x209   :  { %v224_v52 = vadd.f32 %v223_v50, %v222_v48  ;;  %v234_v53 = vadd.f32 %v233_v51, %v232_v49 }
 0x20b   :  { %v225_v54 = vrot.slane %v224_v52, 2  ;;  %v235_v55 = vrot.slane %v234_v53, 2 }
 0x20d   :  { %v226_v56 = vadd.f32 %v225_v54, %v224_v52  ;;  %v236_v57 = vadd.f32 %v235_v55, %v234_v53 }
 0x20f   :  { %v227_v58 = vrot.slane %v226_v56, 1  ;;  %v237_v59 = vrot.slane %v236_v57, 1 }
 0x211   :  { %v228_v60 = vadd.f32 %v227_v58, %v226_v56  ;;  %v238_v61 = vadd.f32 %v237_v59, %v236_v57 }
 0x213   :  { %277 = vpush %v228_v60 }
 0x214   :  { %279 = vpush %v238_v61 }
 0x244   :  { %s278_s4 = spop %277 }
 0x245   :  { %v246_v1 = vstv %s278_s4  ;;  %s280_s28 = spop %279 }
 0x246   :  { %v247_v3 = vsel %vm245_vm15, %v246_v1, 0.0  ;;  %v250_v4 = vstv %s280_s28 }
 0x247   :  { %v248_v5 = vadd.f32 %v247_v3, %v244_v2  ;;  %v251_v6 = vsel %vm249_vm0, %v250_v4, 0.0 }
 0x249   :  { %v252_v7 = vadd.f32 %v251_v6, %v248_v5 }
 0x24b   :  { %253 = vst [vmem:[#allocation5] sm:$0x1] %v252_v7 }
 0x24c   :  { %264 = dma.vmem_to_hbm [thread:$0]  %s260_s30, 16, %s262_s8, [#allocation4]  }
 0x24d   :  { %353 = dma.done.wait [#allocation4], 16  }
 0x24e   :  { %354 = vsyncadd [#allocation4], 4294967280 }
 0x24f   :  { %269 = vsyncpa [#allocation3], 1 }
 0x250   :  { %270 = vsyncpa [#allocation4], 1 }

</bundles_post_ra>
